<compile_context>
chip_gen: v5e
topology: v5e:2x2
jax: 0.10.0
libtpu: 0.0.40
codegen_flags: <defaults>
</compile_context>

<pallas_src>
import jax
import jax.numpy as jnp
import numpy as np
from jax.experimental import pallas as pl
from jax.experimental.pallas import tpu as pltpu


def rnn_attn_kernel(x_ref, h0_ref, wih_ref, whh_ref, brnn_ref,
                    wah_ref, wae_ref, ba_ref, v_ref, wfc_ref, bfc_ref,
                    logp_ref, hfin_ref):
    seq, bsz, in_sz = x_ref.shape
    hsz = h0_ref.shape[1]

    # ---- Hoisted input projection: one GEMM for all timesteps, bias folded ----
    x2 = x_ref[...].reshape(seq * bsz, in_sz)                       # (S*B, IN)
    xw = (jnp.dot(x2, wih_ref[...], preferred_element_type=jnp.float32)
          + brnn_ref[...])                                          # (S*B, H)

    # ---- Fully-unrolled recurrence; h and encoder outputs stay in vregs ----
    whh = whh_ref[...]                                              # hoisted read
    h = h0_ref[...]                                                 # (B, H)
    hs = []
    for t in range(seq):                                            # static, unrolled
        h = jnp.tanh(xw[t * bsz:(t + 1) * bsz, :]
                     + jnp.dot(h, whh, preferred_element_type=jnp.float32))
        hs.append(h)
    enc = jnp.concatenate(hs, axis=0)                               # (S*B, H)
    hfin_ref[...] = h

    # ---- Attention over encoder outputs (per sequence) ----
    h_term = jnp.dot(h, wah_ref[...], preferred_element_type=jnp.float32)    # (B, H)
    e_term = jnp.dot(enc, wae_ref[...], preferred_element_type=jnp.float32)  # (S*B, H)
    energy = jnp.tanh(e_term.reshape(seq, bsz, hsz) + h_term + ba_ref[...])  # (S, B, H)

    # MXU matvec against v instead of a VPU multiply + XLU lane-reduce.
    scores = jnp.dot(energy.reshape(seq * bsz, hsz), v_ref[...],
                     preferred_element_type=jnp.float32)                     # (S*B, 1)
    scores = scores.reshape(seq, bsz, 1)                                     # (S, B, 1)

    # Softmax over the sequence axis (leading axis -> plain vreg adds, no XLU).
    m = jnp.max(scores, axis=0, keepdims=True)                               # (1, B, 1)
    e = jnp.exp(scores - m)
    denom = jnp.sum(e, axis=0, keepdims=True)                                # (1, B, 1)
    attn = e * pl.reciprocal(denom, approx=True)                             # (S, B, 1)

    # ---- Context + fc + LogSoftmax ----
    context = jnp.sum(attn * enc.reshape(seq, bsz, hsz), axis=0)             # (B, H)
    logits = (jnp.dot(context, wfc_ref[...], preferred_element_type=jnp.float32)
              + bfc_ref[...])                                                # (B, OUT)
    lmax = jnp.max(logits, axis=1, keepdims=True)
    lse = lmax + jnp.log(jnp.sum(jnp.exp(logits - lmax), axis=1, keepdims=True))
    logp_ref[...] = logits - lse


def rnn_with_attention(x, hidden, params):
    """x: (seq, B, IN), hidden: (1, B, H). Returns (log_probs (B, OUT), hidden (1, B, H))."""
    seq, bsz, _ = x.shape
    assert seq >= 1
    H = hidden.shape[-1]
    OUT = params["W_fc"].shape[1]

    x3 = x.astype(jnp.float32)
    h0 = hidden.reshape(bsz, H).astype(jnp.float32)

    args = (x3, h0, params["W_ih"], params["W_hh"], params["b_rnn"],
            params["W_att_h"], params["W_att_e"], params["b_att"],
            params["v"], params["W_fc"], params["b_fc"])

    # Whole problem (a few KiB) lives in VMEM; no grid, no scratch needed.
    # (Working set is tiny on all generations, incl. v7x's 64 MiB VMEM.)
    vmem = pl.BlockSpec(memory_space=pltpu.MemorySpace.VMEM)
    logp, hfin = pl.pallas_call(
        rnn_attn_kernel,
        out_shape=(jax.ShapeDtypeStruct((bsz, OUT), jnp.float32),
                   jax.ShapeDtypeStruct((bsz, H), jnp.float32)),
        in_specs=[vmem] * len(args),
        out_specs=(vmem, vmem),
    )(*args)
    return logp, hfin.reshape(1, bsz, H)


def reference(x, hidden, params):
    """Pure-JAX reference with identical (per-sample) semantics."""
    seq, bsz, _ = x.shape
    H = hidden.shape[-1]
    h = hidden.reshape(bsz, H)
    outs = []
    for t in range(seq):
        h = jnp.tanh(x[t] @ params["W_ih"] + h @ params["W_hh"] + params["b_rnn"])
        outs.append(h)
    enc = jnp.stack(outs, axis=0)                                   # (seq, bsz, H)
    energy = jnp.tanh(h @ params["W_att_h"] + enc @ params["W_att_e"] + params["b_att"])
    scores = (energy @ params["v"])[..., 0]                         # (seq, bsz)
    attn = jax.nn.softmax(scores, axis=0)                           # softmax over seq
    context = jnp.einsum("sb,sbh->bh", attn, enc)                   # (bsz, H)
    logits = context @ params["W_fc"] + params["b_fc"]
    return jax.nn.log_softmax(logits, axis=1), h.reshape(1, bsz, H)


def init_params(key, input_size, hidden_size, output_size):
    """Deterministic parameters with PyTorch-default init scales, stored kernel-layout."""
    ks = jax.random.split(key, 9)
    kr = 1.0 / np.sqrt(hidden_size)
    ka = 1.0 / np.sqrt(2 * hidden_size)
    u = lambda k, shape, s: jax.random.uniform(k, shape, jnp.float32, -s, s)

    w_ih = u(ks[0], (hidden_size, input_size), kr)        # torch rnn.weight_ih_l0
    w_hh = u(ks[1], (hidden_size, hidden_size), kr)       # torch rnn.weight_hh_l0
    b_ih = u(ks[2], (hidden_size,), kr)
    b_hh = u(ks[3], (hidden_size,), kr)
    w_attn = u(ks[4], (hidden_size, 2 * hidden_size), ka)  # attn.attn.weight
    b_attn = u(ks[5], (hidden_size,), ka)
    v = jax.random.uniform(ks[6], (hidden_size,), jnp.float32)      # torch.rand
    w_fc = u(ks[7], (output_size, hidden_size), kr)       # fc.weight
    b_fc = u(ks[8], (output_size,), kr)

    return {
        "W_ih": w_ih.T,
        "W_hh": w_hh.T,
        "b_rnn": (b_ih + b_hh).reshape(1, hidden_size),
        "W_att_h": w_attn[:, :hidden_size].T,
        "W_att_e": w_attn[:, hidden_size:].T,
        "b_att": b_attn.reshape(1, hidden_size),
        "v": v.reshape(hidden_size, 1),                   # pre-transposed for MXU matvec
        "W_fc": w_fc.T,
        "b_fc": b_fc.reshape(1, output_size),
    }


if __name__ == "__main__":
    embedding_size = 16          # input_size (vocab embedding size)
    hidden_size = 32
    output_size = 20             # len(nodes) = 20
    seq_len = 8
    batch = 8                    # pack 8 independent sequences on sublanes (tile aligned)

    key = jax.random.PRNGKey(0)
    kx, kp = jax.random.split(key)
    x = jax.random.normal(kx, (seq_len, batch, embedding_size), jnp.float32)
    h0 = jnp.zeros((1, batch, hidden_size), jnp.float32)   # init_hidden()
    params = init_params(kp, embedding_size, hidden_size, output_size)

    log_probs, h_final = rnn_with_attention(x, h0, params)
    log_probs = jax.block_until_ready(log_probs)
    h_final = jax.block_until_ready(h_final)

    ref_lp, ref_h = reference(x, h0, params)
    # log_probs tolerance reflects the approximate EUP reciprocal used for the
    # attention-softmax normalization (per perf guidance); hidden is exact-path.
    np.testing.assert_allclose(np.asarray(log_probs), np.asarray(ref_lp), rtol=5e-3, atol=5e-3)
    np.testing.assert_allclose(np.asarray(h_final), np.asarray(ref_h), rtol=1e-5, atol=1e-5)

    print("KERNEL_OK")
</pallas_src>

<mosaic_0001>
module attributes {stable_mosaic.version = 11 : i64} {
  func.func @rnn_attn_kernel(%arg0: memref<8x8x16xf32, #tpu.memory_space<vmem>>, %arg1: memref<8x32xf32, #tpu.memory_space<vmem>>, %arg2: memref<16x32xf32, #tpu.memory_space<vmem>>, %arg3: memref<32x32xf32, #tpu.memory_space<vmem>>, %arg4: memref<1x32xf32, #tpu.memory_space<vmem>>, %arg5: memref<32x32xf32, #tpu.memory_space<vmem>>, %arg6: memref<32x32xf32, #tpu.memory_space<vmem>>, %arg7: memref<1x32xf32, #tpu.memory_space<vmem>>, %arg8: memref<32x1xf32, #tpu.memory_space<vmem>>, %arg9: memref<32x20xf32, #tpu.memory_space<vmem>>, %arg10: memref<1x20xf32, #tpu.memory_space<vmem>>, %arg11: memref<8x20xf32, #tpu.memory_space<vmem>>, %arg12: memref<8x32xf32, #tpu.memory_space<vmem>>) attributes {dimension_semantics = [], scalar_prefetch = 0 : i64, scratch_operands = 0 : i64, tpu.core_type = #tpu.core_type<tc>} {
    %c0 = arith.constant 0 : index
    %c0_0 = arith.constant 0 : index
    %c0_1 = arith.constant 0 : index
    %0 = vector.load %arg0[%c0, %c0_0, %c0_1] : memref<8x8x16xf32, #tpu.memory_space<vmem>>, vector<8x8x16xf32>
    %1 = vector.shape_cast %0 : vector<8x8x16xf32> to vector<64x16xf32>
    %c0_2 = arith.constant 0 : index
    %c0_3 = arith.constant 0 : index
    %2 = vector.load %arg2[%c0_2, %c0_3] : memref<16x32xf32, #tpu.memory_space<vmem>>, vector<16x32xf32>
    %cst = arith.constant dense<0.000000e+00> : vector<64x32xf32>
    %3 = tpu.matmul %1, %2, %cst {dimension_numbers = #tpu.dot_dimension_numbers<[1], [0], [0], [1], [0, 0, 1, 1], [], []>} : vector<64x16xf32>, vector<16x32xf32>, vector<64x32xf32> -> vector<64x32xf32>
    %c0_4 = arith.constant 0 : index
    %c0_5 = arith.constant 0 : index
    %4 = vector.load %arg4[%c0_4, %c0_5] : memref<1x32xf32, #tpu.memory_space<vmem>>, vector<1x32xf32>
    %5 = vector.broadcast %4 : vector<1x32xf32> to vector<64x32xf32>
    %6 = arith.addf %3, %5 : vector<64x32xf32>
    %c0_6 = arith.constant 0 : index
    %c0_7 = arith.constant 0 : index
    %7 = vector.load %arg3[%c0_6, %c0_7] : memref<32x32xf32, #tpu.memory_space<vmem>>, vector<32x32xf32>
    %c0_8 = arith.constant 0 : index
    %c0_9 = arith.constant 0 : index
    %8 = vector.load %arg1[%c0_8, %c0_9] : memref<8x32xf32, #tpu.memory_space<vmem>>, vector<8x32xf32>
    %9 = vector.extract_strided_slice %6 {offsets = [0, 0], sizes = [8, 32], strides = [1, 1]} : vector<64x32xf32> to vector<8x32xf32>
    %cst_10 = arith.constant dense<0.000000e+00> : vector<8x32xf32>
    %10 = tpu.matmul %8, %7, %cst_10 {dimension_numbers = #tpu.dot_dimension_numbers<[1], [0], [0], [1], [0, 0, 1, 1], [], []>} : vector<8x32xf32>, vector<32x32xf32>, vector<8x32xf32> -> vector<8x32xf32>
    %11 = arith.addf %9, %10 : vector<8x32xf32>
    %12 = math.tanh %11 : vector<8x32xf32>
    %13 = vector.extract_strided_slice %6 {offsets = [8, 0], sizes = [8, 32], strides = [1, 1]} : vector<64x32xf32> to vector<8x32xf32>
    %cst_11 = arith.constant dense<0.000000e+00> : vector<8x32xf32>
    %14 = tpu.matmul %12, %7, %cst_11 {dimension_numbers = #tpu.dot_dimension_numbers<[1], [0], [0], [1], [0, 0, 1, 1], [], []>} : vector<8x32xf32>, vector<32x32xf32>, vector<8x32xf32> -> vector<8x32xf32>
    %15 = arith.addf %13, %14 : vector<8x32xf32>
    %16 = math.tanh %15 : vector<8x32xf32>
    %17 = vector.extract_strided_slice %6 {offsets = [16, 0], sizes = [8, 32], strides = [1, 1]} : vector<64x32xf32> to vector<8x32xf32>
    %cst_12 = arith.constant dense<0.000000e+00> : vector<8x32xf32>
    %18 = tpu.matmul %16, %7, %cst_12 {dimension_numbers = #tpu.dot_dimension_numbers<[1], [0], [0], [1], [0, 0, 1, 1], [], []>} : vector<8x32xf32>, vector<32x32xf32>, vector<8x32xf32> -> vector<8x32xf32>
    %19 = arith.addf %17, %18 : vector<8x32xf32>
    %20 = math.tanh %19 : vector<8x32xf32>
    %21 = vector.extract_strided_slice %6 {offsets = [24, 0], sizes = [8, 32], strides = [1, 1]} : vector<64x32xf32> to vector<8x32xf32>
    %cst_13 = arith.constant dense<0.000000e+00> : vector<8x32xf32>
    %22 = tpu.matmul %20, %7, %cst_13 {dimension_numbers = #tpu.dot_dimension_numbers<[1], [0], [0], [1], [0, 0, 1, 1], [], []>} : vector<8x32xf32>, vector<32x32xf32>, vector<8x32xf32> -> vector<8x32xf32>
    %23 = arith.addf %21, %22 : vector<8x32xf32>
    %24 = math.tanh %23 : vector<8x32xf32>
    %25 = vector.extract_strided_slice %6 {offsets = [32, 0], sizes = [8, 32], strides = [1, 1]} : vector<64x32xf32> to vector<8x32xf32>
    %cst_14 = arith.constant dense<0.000000e+00> : vector<8x32xf32>
    %26 = tpu.matmul %24, %7, %cst_14 {dimension_numbers = #tpu.dot_dimension_numbers<[1], [0], [0], [1], [0, 0, 1, 1], [], []>} : vector<8x32xf32>, vector<32x32xf32>, vector<8x32xf32> -> vector<8x32xf32>
    %27 = arith.addf %25, %26 : vector<8x32xf32>
    %28 = math.tanh %27 : vector<8x32xf32>
    %29 = vector.extract_strided_slice %6 {offsets = [40, 0], sizes = [8, 32], strides = [1, 1]} : vector<64x32xf32> to vector<8x32xf32>
    %cst_15 = arith.constant dense<0.000000e+00> : vector<8x32xf32>
    %30 = tpu.matmul %28, %7, %cst_15 {dimension_numbers = #tpu.dot_dimension_numbers<[1], [0], [0], [1], [0, 0, 1, 1], [], []>} : vector<8x32xf32>, vector<32x32xf32>, vector<8x32xf32> -> vector<8x32xf32>
    %31 = arith.addf %29, %30 : vector<8x32xf32>
    %32 = math.tanh %31 : vector<8x32xf32>
    %33 = vector.extract_strided_slice %6 {offsets = [48, 0], sizes = [8, 32], strides = [1, 1]} : vector<64x32xf32> to vector<8x32xf32>
    %cst_16 = arith.constant dense<0.000000e+00> : vector<8x32xf32>
    %34 = tpu.matmul %32, %7, %cst_16 {dimension_numbers = #tpu.dot_dimension_numbers<[1], [0], [0], [1], [0, 0, 1, 1], [], []>} : vector<8x32xf32>, vector<32x32xf32>, vector<8x32xf32> -> vector<8x32xf32>
    %35 = arith.addf %33, %34 : vector<8x32xf32>
    %36 = math.tanh %35 : vector<8x32xf32>
    %37 = vector.extract_strided_slice %6 {offsets = [56, 0], sizes = [8, 32], strides = [1, 1]} : vector<64x32xf32> to vector<8x32xf32>
    %cst_17 = arith.constant dense<0.000000e+00> : vector<8x32xf32>
    %38 = tpu.matmul %36, %7, %cst_17 {dimension_numbers = #tpu.dot_dimension_numbers<[1], [0], [0], [1], [0, 0, 1, 1], [], []>} : vector<8x32xf32>, vector<32x32xf32>, vector<8x32xf32> -> vector<8x32xf32>
    %39 = arith.addf %37, %38 : vector<8x32xf32>
    %40 = math.tanh %39 : vector<8x32xf32>
    %41 = tpu.concatenate %12, %16, %20, %24, %28, %32, %36, %40 in 0 : vector<8x32xf32>, vector<8x32xf32>, vector<8x32xf32>, vector<8x32xf32>, vector<8x32xf32>, vector<8x32xf32>, vector<8x32xf32>, vector<8x32xf32> -> vector<64x32xf32>
    %c0_18 = arith.constant 0 : index
    %c0_19 = arith.constant 0 : index
    %42 = vector.load %arg12[%c0_18, %c0_19] : memref<8x32xf32, #tpu.memory_space<vmem>>, vector<8x32xf32>
    tpu.vector_store %arg12[%c0_18, %c0_19], %40 {strides = array<i32>} : memref<8x32xf32, #tpu.memory_space<vmem>>, vector<8x32xf32>,
    %c0_20 = arith.constant 0 : index
    %c0_21 = arith.constant 0 : index
    %43 = vector.load %arg5[%c0_20, %c0_21] : memref<32x32xf32, #tpu.memory_space<vmem>>, vector<32x32xf32>
    %cst_22 = arith.constant dense<0.000000e+00> : vector<8x32xf32>
    %44 = tpu.matmul %40, %43, %cst_22 {dimension_numbers = #tpu.dot_dimension_numbers<[1], [0], [0], [1], [0, 0, 1, 1], [], []>} : vector<8x32xf32>, vector<32x32xf32>, vector<8x32xf32> -> vector<8x32xf32>
    %c0_23 = arith.constant 0 : index
    %c0_24 = arith.constant 0 : index
    %45 = vector.load %arg6[%c0_23, %c0_24] : memref<32x32xf32, #tpu.memory_space<vmem>>, vector<32x32xf32>
    %cst_25 = arith.constant dense<0.000000e+00> : vector<64x32xf32>
    %46 = tpu.matmul %41, %45, %cst_25 {dimension_numbers = #tpu.dot_dimension_numbers<[1], [0], [0], [1], [0, 0, 1, 1], [], []>} : vector<64x32xf32>, vector<32x32xf32>, vector<64x32xf32> -> vector<64x32xf32>
    %47 = vector.shape_cast %46 : vector<64x32xf32> to vector<8x8x32xf32>
    %48 = vector.shape_cast %44 : vector<8x32xf32> to vector<1x8x32xf32>
    %49 = vector.broadcast %48 : vector<1x8x32xf32> to vector<8x8x32xf32>
    %50 = arith.addf %47, %49 : vector<8x8x32xf32>
    %c0_26 = arith.constant 0 : index
    %c0_27 = arith.constant 0 : index
    %51 = vector.load %arg7[%c0_26, %c0_27] : memref<1x32xf32, #tpu.memory_space<vmem>>, vector<1x32xf32>
    %52 = vector.shape_cast %51 : vector<1x32xf32> to vector<1x1x32xf32>
    %53 = vector.broadcast %52 : vector<1x1x32xf32> to vector<8x8x32xf32>
    %54 = arith.addf %50, %53 : vector<8x8x32xf32>
    %55 = math.tanh %54 : vector<8x8x32xf32>
    %56 = vector.shape_cast %55 : vector<8x8x32xf32> to vector<64x32xf32>
    %c0_28 = arith.constant 0 : index
    %c0_29 = arith.constant 0 : index
    %57 = vector.load %arg8[%c0_28, %c0_29] : memref<32x1xf32, #tpu.memory_space<vmem>>, vector<32x1xf32>
    %cst_30 = arith.constant dense<0.000000e+00> : vector<64x1xf32>
    %58 = tpu.matmul %56, %57, %cst_30 {dimension_numbers = #tpu.dot_dimension_numbers<[1], [0], [0], [1], [0, 0, 1, 1], [], []>} : vector<64x32xf32>, vector<32x1xf32>, vector<64x1xf32> -> vector<64x1xf32>
    %59 = vector.shape_cast %58 : vector<64x1xf32> to vector<8x8x1xf32>
    %cst_31 = arith.constant dense<0xFF800000> : vector<8x1xf32>
    %60 = vector.multi_reduction <maximumf>, %59, %cst_31 [0] : vector<8x8x1xf32> to vector<8x1xf32>
    %61 = vector.shape_cast %60 : vector<8x1xf32> to vector<1x8x1xf32>
    %62 = vector.broadcast %61 : vector<1x8x1xf32> to vector<8x8x1xf32>
    %63 = arith.subf %59, %62 : vector<8x8x1xf32>
    %64 = math.exp %63 : vector<8x8x1xf32>
    %cst_32 = arith.constant dense<0.000000e+00> : vector<8x1xf32>
    %65 = vector.multi_reduction <add>, %64, %cst_32 [0] : vector<8x8x1xf32> to vector<8x1xf32>
    %66 = vector.shape_cast %65 : vector<8x1xf32> to vector<1x8x1xf32>
    %67 = tpu.reciprocal %66 {approx = true} : vector<1x8x1xf32> -> vector<1x8x1xf32>
    %68 = vector.broadcast %67 : vector<1x8x1xf32> to vector<8x8x1xf32>
    %69 = arith.mulf %64, %68 : vector<8x8x1xf32>
    %70 = vector.shape_cast %41 : vector<64x32xf32> to vector<8x8x32xf32>
    %71 = vector.broadcast %69 : vector<8x8x1xf32> to vector<8x8x32xf32>
    %72 = arith.mulf %71, %70 : vector<8x8x32xf32>
    %cst_33 = arith.constant dense<0.000000e+00> : vector<8x32xf32>
    %73 = vector.multi_reduction <add>, %72, %cst_33 [0] : vector<8x8x32xf32> to vector<8x32xf32>
    %c0_34 = arith.constant 0 : index
    %c0_35 = arith.constant 0 : index
    %74 = vector.load %arg9[%c0_34, %c0_35] : memref<32x20xf32, #tpu.memory_space<vmem>>, vector<32x20xf32>
    %cst_36 = arith.constant dense<0.000000e+00> : vector<8x20xf32>
    %75 = tpu.matmul %73, %74, %cst_36 {dimension_numbers = #tpu.dot_dimension_numbers<[1], [0], [0], [1], [0, 0, 1, 1], [], []>} : vector<8x32xf32>, vector<32x20xf32>, vector<8x20xf32> -> vector<8x20xf32>
    %c0_37 = arith.constant 0 : index
    %c0_38 = arith.constant 0 : index
    %76 = vector.load %arg10[%c0_37, %c0_38] : memref<1x20xf32, #tpu.memory_space<vmem>>, vector<1x20xf32>
    %77 = vector.broadcast %76 : vector<1x20xf32> to vector<8x20xf32>
    %78 = arith.addf %75, %77 : vector<8x20xf32>
    %cst_39 = arith.constant dense<0xFF800000> : vector<8xf32>
    %79 = vector.multi_reduction <maximumf>, %78, %cst_39 [1] : vector<8x20xf32> to vector<8xf32>
    %80 = vector.shape_cast %79 : vector<8xf32> to vector<8x1xf32>
    %81 = vector.broadcast %80 : vector<8x1xf32> to vector<8x20xf32>
    %82 = arith.subf %78, %81 : vector<8x20xf32>
    %83 = math.exp %82 : vector<8x20xf32>
    %cst_40 = arith.constant dense<0.000000e+00> : vector<8xf32>
    %84 = vector.multi_reduction <add>, %83, %cst_40 [1] : vector<8x20xf32> to vector<8xf32>
    %85 = vector.shape_cast %84 : vector<8xf32> to vector<8x1xf32>
    %86 = math.log %85 : vector<8x1xf32>
    %87 = arith.addf %80, %86 : vector<8x1xf32>
    %88 = vector.broadcast %87 : vector<8x1xf32> to vector<8x20xf32>
    %89 = arith.subf %78, %88 : vector<8x20xf32>
    %c0_41 = arith.constant 0 : index
    %c0_42 = arith.constant 0 : index
    %90 = vector.load %arg11[%c0_41, %c0_42] : memref<8x20xf32, #tpu.memory_space<vmem>>, vector<8x20xf32>
    tpu.vector_store %arg11[%c0_41, %c0_42], %89 {strides = array<i32>} : memref<8x20xf32, #tpu.memory_space<vmem>>, vector<8x20xf32>,
    return
  }
}

</mosaic_0001>

<bundles_post_ra>
// kernel: tpu_custom_call.1
= control target key start
LH: loop header
LB: loop body
LE: loop exit
PB: predicated region body
PF: predicated region fallthrough
CT: control target
= control target key end

     0   :  { %18 = vsyncpa [#allocation3], 0  ;;  %s1361_s0 = inlined_call_operand.vmem [shape: f32[8,8,16], index: 0, kind: input, shape index: {}]   ;;  %s1362_s1 = inlined_call_operand.vmem [shape: f32[8,32], index: 1, kind: input, shape index: {}]   ;;  %s1363_s2 = inlined_call_operand.hbm [shape: f32[16,32], index: 2, kind: input, shape index: {}]   ;;  %s1364_s3 = inlined_call_operand.hbm [shape: f32[32,32], index: 3, kind: input, shape index: {}]   ;;  %s1365_s4 = inlined_call_operand.vmem [shape: f32[1,32], index: 4, kind: input, shape index: {}]   ;;  %s1366_s5 = inlined_call_operand.hbm [shape: f32[32,32], index: 5, kind: input, shape index: {}]   ;;  %s1367_s6 = inlined_call_operand.hbm [shape: f32[32,32], index: 6, kind: input, shape index: {}]   ;;  %s1368_s7 = inlined_call_operand.hbm [shape: f32[1,32], index: 7, kind: input, shape index: {}]   ;;  %s1369_s8 = inlined_call_operand.vmem [shape: f32[32,1], index: 8, kind: input, shape index: {}]   ;;  %s1370_s9 = inlined_call_operand.vmem [shape: f32[32,20], index: 9, kind: input, shape index: {}]   ;;  %s1371_s10 = inlined_call_operand.vmem [shape: f32[1,20], index: 10, kind: input, shape index: {}]   ;;  %s1372_s11 = inlined_call_operand.hbm [shape: f32[8,20], index: 11, kind: output, shape index: {0}]   ;;  %s1373_s12 = inlined_call_operand.hbm [shape: f32[8,32], index: 12, kind: output, shape index: {1}]  }
   0x1   :  { %19 = vsyncpa [#allocation6], 0 }
   0x2   :  { %20 = vsyncpa [#allocation9], 0 }
   0x3   :  { %21 = vsyncpa [#allocation4], 0 }
   0x4   :  { %22 = vsyncpa [#allocation13], 0  ;;  %s44_s23 = sshll.u32 %s1364_s3, 4  ;;  %s1072_s24 = smov [#allocation5]   ;;  %s45_s23 = int_to_ptr.hbm [resolvable:$true] %s44_s23 }
   0x5   :  { %s46_s25 = sshll.u32 %s1072_s24, 4  ;;  %s72_s28 = sshll.u32 %s1367_s6, 4  ;;  %s47_s25 = int_to_ptr.vmem [resolvable:$true] %s46_s25  ;;  %s73_s28 = int_to_ptr.hbm [resolvable:$true] %s72_s28 }
   0x6   :  { %s1073_s29 = smov 128   ;;  %s1074_s30 = smov 8  }
   0x7   :  { %52 = dma.hbm_to_vmem [thread:$0]  %s45_s23, 512, %s47_s25, [#allocation6], %s1073_s29, %s1073_s29, %s1074_s30  }
   0x8   :  { %s1075_s13 = smov [#allocation8]   ;;  %s31_s17 = sshll.u32 %s1363_s2, 4  ;;  %s32_s17 = int_to_ptr.hbm [resolvable:$true] %s31_s17 }
   0x9   :  { %s74_s14 = sshll.u32 %s1075_s13, 4  ;;  %s59_s19 = sshll.u32 %s1366_s5, 4  ;;  %s75_s14 = int_to_ptr.vmem [resolvable:$true] %s74_s14  ;;  %s60_s19 = int_to_ptr.hbm [resolvable:$true] %s59_s19 }
   0xa   :  { %80 = dma.hbm_to_vmem [thread:$0]  %s73_s28, 512, %s75_s14, [#allocation9], %s1073_s29, %s1073_s29, %s1074_s30  }
   0xb   :  { %s1076_s20 = smov [#allocation2]   ;;  %s1077_s6 = smov [#allocation7]  }
   0xc   :  { %s33_s21 = sshll.u32 %s1076_s20, 4  ;;  %s61_s22 = sshll.u32 %s1077_s6, 4  ;;  %s34_s21 = int_to_ptr.vmem [resolvable:$true] %s33_s21  ;;  %s62_s22 = int_to_ptr.vmem [resolvable:$true] %s61_s22 }
   0xd   :  { %39 = dma.hbm_to_vmem [thread:$0]  %s32_s17, 256, %s34_s21, [#allocation3], %s1073_s29, %s1073_s29, %s1074_s30  }
   0xe   :  { %s86_s25 = sshll.u32 %s1368_s7, 4  ;;  %s1078_s2 = smov [#allocation10]   ;;  %s87_s25 = int_to_ptr.hbm [resolvable:$true] %s86_s25 }
   0xf   :  { %67 = dma.hbm_to_vmem [thread:$0]  %s60_s19, 512, %s62_s22, [#allocation6], %s1073_s29, %s1073_s29, %s1074_s30  }
  0x10   :  { %s88_s26 = sshll.u32 %s1078_s2, 4  ;;  %s89_s26 = int_to_ptr.vmem [resolvable:$true] %s88_s26 }
  0x11   :  { %91 = dma.hbm_to_vmem [thread:$0]  %s87_s25, 16, %s89_s26, [#allocation9]  }
  0x12   :  { %1062 = dma.done.wait [#allocation3], 256  }
  0x13   :  { %1063 = vsyncadd [#allocation3], 4294967040 }
  0x14   :  { %1064 = dma.done.wait [#allocation6], 1024  }
  0x15   :  { %1065 = vsyncadd [#allocation6], 4294966272 }
  0x16   :  { %1066 = dma.done.wait [#allocation9], 528  }
  0x17   :  { %1067 = vsyncadd [#allocation9], 4294966768  ;;  %v127_v0 = vld [vmem:[#allocation2 + $0x8] sm:$0xff]  ;;  %v126_v1 = vld [vmem:[#allocation2] sm:$0xff]  ;;  %vm132_vm0 = vcmask 130048   ;;  %vm203_vm1 = vcmask 261120  }
  0x18   :  { %171 = vmatpush.msra.mxu0 %v127_v0  ;;  %v118_v2 = vld [vmem:[%s1361_s0] sm:$0xff]  ;;  %v1165_v3 = vld [vmem:[#allocation5 + $0x18] sm:$0xff]  ;;  %v1175_v5 = vld [vmem:[#allocation5 + $0x8] sm:$0xff]  ;;  %vm574_vm2 = vcmask 7168   ;;  %vm732_vm3 = vcmask 162816   ;;  %s1080_s17 = smov [#allocation12]  }
  0x19   :  { %v1167_v4 = vld [vmem:[#allocation5 + $0x10] sm:$0xff]  ;;  %244 = vmatpush.msra.mxu2 %v1165_v3  ;;  %269 = vmatpush.msra.mxu3 %v1165_v3  ;;  %v119_v6 = vld [vmem:[%s1361_s0 + $0x8] sm:$0xff]  ;;  %v120_v7 = vld [vmem:[%s1361_s0 + $0x10] sm:$0xff]  ;;  %s763_s3 = sshll.u32 %s1080_s17, 4  ;;  %s1081_s20 = smov [#allocation11]   ;;  %s764_s3 = int_to_ptr.vmem [resolvable:$true] %s763_s3 }
  0x1a   :  { %172 = vmatpush.msra.mxu0 %v126_v1  ;;  %294 = vmatpush.msra.mxu1 %v1165_v3  ;;  %v198_v8 = vld [vmem:[#allocation5] sm:$0xff]  ;;  %v121_v9 = vld [vmem:[%s1361_s0 + $0x18] sm:$0xff]  ;;  %v122_v10 = vld [vmem:[%s1361_s0 + $0x20] sm:$0xff]  ;;  %s752_s21 = sshll.u32 %s1081_s20, 4  ;;  %s754_s23 = sshll.u32 %s1372_s11, 4  ;;  %s753_s21 = int_to_ptr.vmem [resolvable:$true] %s752_s21  ;;  %s755_s23 = int_to_ptr.hbm [resolvable:$true] %s754_s23 }
  0x1b   :  { %782 = vmatmul.msk.f32.vlgmr.msra.gmra.mxu0 %vm132_vm0, %v118_v2  ;;  %245 = vmatpush.msra.mxu2 %v1167_v4  ;;  %v123_v11 = vld [vmem:[%s1361_s0 + $0x28] sm:$0xff]  ;;  %v124_v12 = vld [vmem:[%s1361_s0 + $0x30] sm:$0xff]  ;;  %v125_v13 = vld [vmem:[%s1361_s0 + $0x38] sm:$0xff] }
  0x1c   :  { %219 = vmatpush.msrb.mxu0 %v1165_v3  ;;  %270 = vmatpush.msra.mxu3 %v1167_v4  ;;  %v202_v14 = vld [vmem:[%s1362_s1] sm:$0xff]  ;;  %v435_v47 = vld [vmem:[#allocation8 + $0x18] sm:$0xff]  ;;  %v433_v49 = vld [vmem:[#allocation8 + $0x8] sm:$0xff] }
  0x1d   :  { %246 = vmatpush.msra.mxu2 %v1175_v5  ;;  %295 = vmatpush.msra.mxu1 %v1167_v4  ;;  %v837_v16 = vld [vmem:[%s1365_s4] ss:$0 sm:$0xff]  ;;  %v432_v50 = vld [vmem:[#allocation8] sm:$0xff]  ;;  %v408_v57 = vld [vmem:[#allocation7 + $0x18] sm:$0xff] }
  0x1e   :  { %220 = vmatpush.msrb.mxu0 %v1167_v4  ;;  %271 = vmatpush.msra.mxu3 %v1175_v5  ;;  %v434_v48 = vld [vmem:[#allocation8 + $0x10] sm:$0xff]  ;;  %v406_v59 = vld [vmem:[#allocation7 + $0x8] sm:$0xff]  ;;  %v405_v60 = vld [vmem:[#allocation7] sm:$0xff] }
  0x1f   :  { %296 = vmatpush.msra.mxu1 %v1175_v5  ;;  %247 = vmatpush.msra.mxu2 %v198_v8  ;;  %v407_v58 = vld [vmem:[#allocation7 + $0x10] sm:$0xff]  ;;  %v508_v0 = vld [vmem:[%s1369_s8 + $0x18] sm:$0xff]  ;;  %v507_v1 = vld [vmem:[%s1369_s8 + $0x10] sm:$0xff] }
  0x20   :  { %221 = vmatpush.msrb.mxu0 %v1175_v5  ;;  %272 = vmatpush.msra.mxu3 %v198_v8  ;;  %v506_v2 = vld [vmem:[%s1369_s8 + $0x8] sm:$0xff] }
  0x21   :  { %297 = vmatpush.msra.mxu1 %v198_v8  ;;  %319 = vmatpush.msrb.mxu2 %v1165_v3 }
  0x22   :  { %222 = vmatpush.msrb.mxu0 %v198_v8  ;;  %344 = vmatpush.msrb.mxu3 %v1165_v3 }
  0x23   :  { %783 = vmatmul.msk.f32.gmra.mxu0 %vm132_vm0, %v119_v6  ;;  %369 = vmatpush.msrb.mxu1 %v1165_v3  ;;  %v838_v6 = vld [vmem:[#allocation10] ss:$0 sm:$0xff] }
  0x24   :  { %320 = vmatpush.msrb.mxu2 %v1167_v4  ;;  %345 = vmatpush.msrb.mxu3 %v1167_v4 }
  0x25   :  { %370 = vmatpush.msrb.mxu1 %v1167_v4 }
  0x26   :  { %321 = vmatpush.msrb.mxu2 %v1175_v5  ;;  %346 = vmatpush.msrb.mxu3 %v1175_v5 }
  0x27   :  { %371 = vmatpush.msrb.mxu1 %v1175_v5 }
  0x28   :  { %322 = vmatpush.msrb.mxu2 %v198_v8  ;;  %347 = vmatpush.msrb.mxu3 %v198_v8 }
  0x29   :  { %372 = vmatpush.msrb.mxu1 %v198_v8 }
  0x2b   :  { %784 = vmatmul.msk.f32.gmra.mxu0 %vm132_vm0, %v120_v7 }
  0x33   :  { %785 = vmatmul.msk.f32.gmra.mxu0 %vm132_vm0, %v121_v9 }
  0x3b   :  { %786 = vmatmul.msk.f32.gmra.mxu0 %vm132_vm0, %v122_v10 }
  0x43   :  { %787 = vmatmul.msk.f32.gmra.mxu0 %vm132_vm0, %v123_v11 }
  0x4b   :  { %788 = vmatmul.msk.f32.gmra.mxu0 %vm132_vm0, %v124_v12 }
  0x53   :  { %789 = vmatmul.msk.f32.gmra.mxu0 %vm132_vm0, %v125_v13 }
  0x5b   :  { %790 = vmatmul.msk.f32.vlgmr.msrb.gmra.mxu0 %vm203_vm1, %v202_v14 }
  0x98   :  { %v174_v15 = vpop.f32.mrf.mxu0 }
  0x99   :  { %v175_v31 = vadd.f32 %v837_v16, %v174_v15 }
  0xa0   :  { %v177_v17 = vpop.f32.mrf.mxu0 }
  0xa1   :  { %v178_v18 = vadd.f32 %v837_v16, %v177_v17 }
  0xa8   :  { %v180_v19 = vpop.f32.mrf.mxu0 }
  0xa9   :  { %v181_v20 = vadd.f32 %v837_v16, %v180_v19 }
  0xb0   :  { %v183_v21 = vpop.f32.mrf.mxu0 }
  0xb1   :  { %v184_v22 = vadd.f32 %v837_v16, %v183_v21 }
  0xb8   :  { %v186_v23 = vpop.f32.mrf.mxu0 }
  0xb9   :  { %v187_v24 = vadd.f32 %v837_v16, %v186_v23 }
  0xc0   :  { %v189_v25 = vpop.f32.mrf.mxu0 }
  0xc1   :  { %v190_v26 = vadd.f32 %v837_v16, %v189_v25 }
  0xc8   :  { %v192_v27 = vpop.f32.mrf.mxu0 }
  0xc9   :  { %v193_v28 = vadd.f32 %v837_v16, %v192_v27 }
  0xd0   :  { %v195_v29 = vpop.f32.mrf.mxu0 }
  0xd1   :  { %v1228_v30 = vadd.f32 %v837_v16, %v195_v29 }
  0xd8   :  { %v224_v32 = vpop.f32.mrf.mxu0 }
  0xd9   :  { %v227_v33 = vadd.f32 %v224_v32, %v175_v31 }
  0xdb   :  { %840 = vtanh.f32 %v227_v33 }
  0xe1   :  { %v1230_v34 = vpop.eup %840 }
  0xe2   :  { %791 = vmatmul.msk.f32.vlgmr.msra.gmra.mxu2 %vm203_vm1, %v1230_v34 }
  0xe3   :  { %394 = vmatpush.msra.mxu2 %v1165_v3  ;;  %v505_v3 = vld [vmem:[%s1369_s8] sm:$0xff] }
  0xe5   :  { %395 = vmatpush.msra.mxu2 %v1167_v4 }
  0xe7   :  { %396 = vmatpush.msra.mxu2 %v1175_v5 }
  0xe9   :  { %397 = vmatpush.msra.mxu2 %v198_v8 }
 0x165   :  { %v249_v35 = vpop.f32.mrf.mxu2 }
 0x166   :  { %v252_v36 = vadd.f32 %v249_v35, %v178_v18 }
 0x168   :  { %842 = vtanh.f32 %v252_v36 }
 0x16e   :  { %v1237_v37 = vpop.eup %842 }
 0x16f   :  { %792 = vmatmul.msk.f32.vlgmr.msra.gmra.mxu3 %vm203_vm1, %v1237_v37 }
 0x170   :  { %424 = vmatpush.msra.mxu3 %v408_v57 }
 0x172   :  { %425 = vmatpush.msra.mxu3 %v407_v58 }
 0x174   :  { %426 = vmatpush.msra.mxu3 %v406_v59 }
 0x176   :  { %427 = vmatpush.msra.mxu3 %v405_v60 }
 0x1f2   :  { %v274_v38 = vpop.f32.mrf.mxu3 }
 0x1f3   :  { %v277_v39 = vadd.f32 %v274_v38, %v181_v20 }
 0x1f5   :  { %844 = vtanh.f32 %v277_v39 }
 0x1fb   :  { %v1241_v40 = vpop.eup %844 }
 0x1fc   :  { %793 = vmatmul.msk.f32.vlgmr.msra.gmra.mxu1 %vm203_vm1, %v1241_v40 }
 0x1fd   :  { %448 = vmatpush.msra.mxu1 %v435_v47 }
 0x1ff   :  { %449 = vmatpush.msra.mxu1 %v434_v48 }
 0x201   :  { %450 = vmatpush.msra.mxu1 %v433_v49 }
 0x203   :  { %451 = vmatpush.msra.mxu1 %v432_v50 }
 0x279   :  { %v299_v41 = vpop.f32.mrf.mxu1 }
 0x27a   :  { %v302_v42 = vadd.f32 %v299_v41, %v184_v22 }
 0x27c   :  { %846 = vtanh.f32 %v302_v42 }
 0x282   :  { %v1245_v43 = vpop.eup %846 }
 0x283   :  { %794 = vmatmul.msk.f32.vlgmr.msrb.gmra.mxu2 %vm203_vm1, %v1245_v43 }
 0x284   :  { %545 = vmatpush.msrb.mxu2 %v508_v0 }
 0x286   :  { %546 = vmatpush.msrb.mxu2 %v507_v1 }
 0x288   :  { %547 = vmatpush.msrb.mxu2 %v506_v2 }
 0x28a   :  { %548 = vmatpush.msrb.mxu2 %v505_v3 }
 0x306   :  { %v324_v44 = vpop.f32.mrf.mxu2 }
 0x307   :  { %v327_v45 = vadd.f32 %v324_v44, %v187_v24 }
 0x309   :  { %848 = vtanh.f32 %v327_v45 }
 0x30f   :  { %v1249_v46 = vpop.eup %848 }
 0x310   :  { %795 = vmatmul.msk.f32.vlgmr.msrb.gmra.mxu3 %vm203_vm1, %v1249_v46 }
 0x311   :  { %816 = vmatpush.msrb.mxu3 %v435_v47 }
 0x313   :  { %817 = vmatpush.msrb.mxu3 %v434_v48  ;;  %v1079_v48 = vmov 0  }
 0x314   :  { %836 = vset.pattern.permute.xlu2 %v1079_v48  ;;  %835 = vset.pattern.permute.xlu1 %v1079_v48 }
 0x315   :  { %818 = vmatpush.msrb.mxu3 %v433_v49  ;;  %834 = vset.pattern.permute.xlu0 %v1079_v48 }
 0x317   :  { %819 = vmatpush.msrb.mxu3 %v432_v50 }
 0x393   :  { %v349_v51 = vpop.f32.mrf.mxu3 }
 0x394   :  { %v352_v52 = vadd.f32 %v349_v51, %v190_v26 }
 0x396   :  { %850 = vtanh.f32 %v352_v52 }
 0x39c   :  { %v1253_v53 = vpop.eup %850 }
 0x39d   :  { %796 = vmatmul.msk.f32.vlgmr.msrb.gmra.mxu1 %vm203_vm1, %v1253_v53 }
 0x3a5   :  { %799 = vmatmul.msk.f32.vlgmr.msra.gmra.mxu1 %vm203_vm1, %v1230_v34 }
 0x3ad   :  { %800 = vmatmul.msk.f32.gmra.mxu1 %vm203_vm1, %v1237_v37 }
 0x3b5   :  { %801 = vmatmul.msk.f32.gmra.mxu1 %vm203_vm1, %v1241_v40 }
 0x3bd   :  { %802 = vmatmul.msk.f32.gmra.mxu1 %vm203_vm1, %v1245_v43 }
 0x3c5   :  { %803 = vmatmul.msk.f32.gmra.mxu1 %vm203_vm1, %v1249_v46 }
 0x3cd   :  { %804 = vmatmul.msk.f32.gmra.mxu1 %vm203_vm1, %v1253_v53 }
 0x41a   :  { %v374_v54 = vpop.f32.mrf.mxu1 }
 0x41b   :  { %v377_v55 = vadd.f32 %v374_v54, %v193_v28 }
 0x41d   :  { %852 = vtanh.f32 %v377_v55 }
 0x422   :  { %v453_v4 = vpop.f32.mrf.mxu1 }
 0x423   :  { %v1269_v56 = vpop.eup %852 }
 0x424   :  { %797 = vmatmul.msk.f32.vlgmr.msra.gmra.mxu2 %vm203_vm1, %v1269_v56 }
 0x42a   :  { %v456_v5 = vpop.f32.mrf.mxu1 }
 0x432   :  { %v459_v11 = vpop.f32.mrf.mxu1 }
 0x43a   :  { %v462_v18 = vpop.f32.mrf.mxu1 }
 0x442   :  { %v465_v28 = vpop.f32.mrf.mxu1 }
 0x44a   :  { %v468_v33 = vpop.f32.mrf.mxu1 }
 0x4a7   :  { %v399_v61 = vpop.f32.mrf.mxu2 }
 0x4a8   :  { %v402_v62 = vadd.f32 %v399_v61, %v1228_v30 }
 0x4aa   :  { %854 = vtanh.f32 %v402_v62 }
 0x4b0   :  { %v1274_v63 = vpop.eup %854 }
 0x4b1   :  { %404 = vst.msk [vmem:[#allocation12] sm:$0xff] %vm203_vm1, %v1274_v63  ;;  %798 = vmatmul.msk.f32.vlgmr.msra.gmra.mxu3 %vm203_vm1, %v1274_v63 }
 0x4b2   :  { %820 = vmatpush.msra.mxu3 %v508_v0 }
 0x4b4   :  { %821 = vmatpush.msra.mxu3 %v507_v1 }
 0x4b6   :  { %822 = vmatpush.msra.mxu3 %v506_v2 }
 0x4b8   :  { %823 = vmatpush.msra.mxu3 %v505_v3 }
 0x4b9   :  { %805 = vmatmul.msk.f32.vlgmr.msrb.gmra.mxu3 %vm203_vm1, %v1269_v56 }
 0x4c1   :  { %806 = vmatmul.msk.f32.gmra.mxu3 %vm203_vm1, %v1274_v63 }
 0x534   :  { %v429_v7 = vpop.f32.mrf.mxu3 }
 0x535   :  { %v477_v8 = vadd.f32 %v453_v4, %v429_v7  ;;  %v478_v10 = vadd.f32 %v456_v5, %v429_v7  ;;  %v479_v17 = vadd.f32 %v459_v11, %v429_v7  ;;  %v480_v25 = vadd.f32 %v462_v18, %v429_v7 }
 0x536   :  { %v481_v30 = vadd.f32 %v465_v28, %v429_v7  ;;  %v482_v35 = vadd.f32 %v468_v33, %v429_v7 }
 0x537   :  { %v489_v9 = vadd.f32 %v838_v6, %v477_v8  ;;  %v490_v13 = vadd.f32 %v838_v6, %v478_v10  ;;  %v491_v20 = vadd.f32 %v838_v6, %v479_v17  ;;  %v492_v26 = vadd.f32 %v838_v6, %v480_v25 }
 0x538   :  { %v493_v31 = vadd.f32 %v838_v6, %v481_v30  ;;  %v494_v36 = vadd.f32 %v838_v6, %v482_v35 }
 0x539   :  { %856 = vtanh.f32 %v489_v9 }
 0x53a   :  { %858 = vtanh.f32 %v490_v13 }
 0x53c   :  { %v471_v12 = vpop.f32.mrf.mxu3 }
 0x53d   :  { %v483_v14 = vadd.f32 %v471_v12, %v429_v7 }
 0x53f   :  { %v857_v15 = vpop.eup %856  ;;  %v495_v16 = vadd.f32 %v838_v6, %v483_v14 }
 0x540   :  { %807 = vmatmul.msk.f32.vlgmr.msrb.gmra.mxu2 %vm203_vm1, %v857_v15  ;;  %v859_v22 = vpop.eup %858 }
 0x541   :  { %860 = vtanh.f32 %v495_v16 }
 0x542   :  { %862 = vtanh.f32 %v491_v20 }
 0x544   :  { %v474_v19 = vpop.f32.mrf.mxu3 }
 0x545   :  { %v484_v21 = vadd.f32 %v474_v19, %v429_v7 }
 0x547   :  { %v861_v23 = vpop.eup %860  ;;  %v496_v24 = vadd.f32 %v838_v6, %v484_v21 }
 0x548   :  { %808 = vmatmul.msk.f32.gmra.mxu2 %vm203_vm1, %v859_v22  ;;  %813 = vmatmul.msk.f32.vlgmr.msra.gmra.mxu3 %vm203_vm1, %v861_v23  ;;  %v863_v27 = vpop.eup %862 }
 0x549   :  { %864 = vtanh.f32 %v496_v24 }
 0x54a   :  { %866 = vtanh.f32 %v492_v26 }
 0x54b   :  { %868 = vtanh.f32 %v493_v31 }
 0x54c   :  { %870 = vtanh.f32 %v494_v36 }
 0x54f   :  { %v865_v29 = vpop.eup %864 }
 0x550   :  { %809 = vmatmul.msk.f32.gmra.mxu2 %vm203_vm1, %v863_v27  ;;  %814 = vmatmul.msk.f32.gmra.mxu3 %vm203_vm1, %v865_v29  ;;  %v867_v32 = vpop.eup %866 }
 0x551   :  { %v869_v38 = vpop.eup %868 }
 0x552   :  { %v871_v39 = vpop.eup %870 }
 0x558   :  { %810 = vmatmul.msk.f32.gmra.mxu2 %vm203_vm1, %v867_v32 }
 0x560   :  { %811 = vmatmul.msk.f32.gmra.mxu2 %vm203_vm1, %v869_v38 }
 0x568   :  { %812 = vmatmul.msk.f32.gmra.mxu2 %vm203_vm1, %v871_v39 }
 0x5c3   :  { %v550_v41 = vpop.f32.mrf.mxu2 }
 0x5c4   :  { %v575_v59 = vsel %vm574_vm2, %v550_v41, -inf }
 0x5cb   :  { %v553_v42 = vpop.f32.mrf.mxu2  ;;  %v568_v47 = vpop.f32.mrf.mxu3 }
 0x5cc   :  { %v576_v60 = vsel %vm574_vm2, %v553_v42, -inf  ;;  %v583_v61 = vsel %vm574_vm2, %v568_v47, -inf }
 0x5d3   :  { %v556_v44 = vpop.f32.mrf.mxu2  ;;  %v571_v50 = vpop.f32.mrf.mxu3 }
 0x5d4   :  { %v577_v52 = vsel %vm574_vm2, %v556_v44, -inf  ;;  %v585_v54 = vsel %vm574_vm2, %v571_v50, -inf }
 0x5d5   :  { %v584_v0 = vmax.f32 %v577_v52, %v583_v61  ;;  %v704_v61 = vld [vmem:[%s1370_s9 + $0x18] sm:$0xff] }
 0x5d6   :  { %724 = vmatpush.msrb.mxu3 %v704_v61 }
 0x5db   :  { %v559_v45 = vpop.f32.mrf.mxu2 }
 0x5dc   :  { %v578_v51 = vsel %vm574_vm2, %v559_v45, -inf }
 0x5dd   :  { %v586_v57 = vmax.f32 %v578_v51, %v585_v54 }
 0x5df   :  { %v588_v3 = vmax.f32 %v584_v0, %v586_v57  ;;  %v702_v0 = vld [vmem:[%s1370_s9 + $0x8] sm:$0xff] }
 0x5e3   :  { %v562_v49 = vpop.f32.mrf.mxu2 }
 0x5e4   :  { %v579_v55 = vsel %vm574_vm2, %v562_v49, -inf }
 0x5e5   :  { %v580_v1 = vmax.f32 %v575_v59, %v579_v55 }
 0x5eb   :  { %v565_v58 = vpop.f32.mrf.mxu2 }
 0x5ec   :  { %v581_v62 = vsel %vm574_vm2, %v565_v58, -inf }
 0x5ed   :  { %v582_v2 = vmax.f32 %v576_v60, %v581_v62  ;;  %v703_v62 = vld [vmem:[%s1370_s9 + $0x10] sm:$0xff] }
 0x5ee   :  { %725 = vmatpush.msrb.mxu3 %v703_v62 }
 0x5ef   :  { %v587_v4 = vmax.f32 %v580_v1, %v582_v2  ;;  %v701_v1 = vld [vmem:[%s1370_s9] sm:$0xff] }
 0x5f0   :  { %726 = vmatpush.msrb.mxu3 %v702_v0 }
 0x5f1   :  { %v589_v5 = vmax.f32 %v587_v4, %v588_v3 }
 0x5f2   :  { %727 = vmatpush.msrb.mxu3 %v701_v1 }
 0x5f3   :  { %v590_v6 = vsub.f32 %v550_v41, %v589_v5  ;;  %v591_v7 = vsub.f32 %v553_v42, %v589_v5  ;;  %v592_v8 = vsub.f32 %v556_v44, %v589_v5  ;;  %v593_v9 = vsub.f32 %v559_v45, %v589_v5 }
 0x5f4   :  { %v594_v10 = vsub.f32 %v562_v49, %v589_v5  ;;  %v595_v14 = vsub.f32 %v565_v58, %v589_v5  ;;  %v596_v16 = vsub.f32 %v568_v47, %v589_v5  ;;  %v597_v19 = vsub.f32 %v571_v50, %v589_v5 }
 0x5f5   :  { %v598_v11 = vmul.f32 1.442695, %v590_v6  ;;  %v600_v12 = vmul.f32 1.442695, %v591_v7  ;;  %v602_v13 = vmul.f32 1.442695, %v592_v8 }
 0x5f6   :  { %v604_v15 = vmul.f32 1.442695, %v593_v9  ;;  %v606_v17 = vmul.f32 1.442695, %v594_v10  ;;  %v608_v18 = vmul.f32 1.442695, %v595_v14 }
 0x5f7   :  { %872 = vpow2.f32 %v598_v11  ;;  %v610_v20 = vmul.f32 1.442695, %v596_v16  ;;  %v612_v23 = vmul.f32 1.442695, %v597_v19 }
 0x5f8   :  { %874 = vpow2.f32 %v600_v12 }
 0x5f9   :  { %876 = vpow2.f32 %v602_v13 }
 0x5fa   :  { %878 = vpow2.f32 %v604_v15 }
 0x5fb   :  { %880 = vpow2.f32 %v606_v17 }
 0x5fc   :  { %882 = vpow2.f32 %v608_v18 }
 0x5fd   :  { %v873_v21 = vpop.eup %872  ;;  %884 = vpow2.f32 %v610_v20 }
 0x5fe   :  { %v875_v22 = vpop.eup %874  ;;  %v614_v24 = vsel %vm574_vm2, %v873_v21, 0.0  ;;  %886 = vpow2.f32 %v612_v23 }
 0x5ff   :  { %v877_v25 = vpop.eup %876  ;;  %v615_v26 = vsel %vm574_vm2, %v875_v22, 0.0 }
 0x600   :  { %v879_v27 = vpop.eup %878  ;;  %v616_v28 = vadd.f32 %v615_v26, %v614_v24  ;;  %v617_v29 = vsel %vm574_vm2, %v877_v25, 0.0 }
 0x601   :  { %v881_v30 = vpop.eup %880  ;;  %v619_v32 = vsel %vm574_vm2, %v879_v27, 0.0 }
 0x602   :  { %v618_v31 = vadd.f32 %v617_v29, %v616_v28  ;;  %v883_v33 = vpop.eup %882  ;;  %v621_v36 = vsel %vm574_vm2, %v881_v30, 0.0 }
 0x603   :  { %v885_v38 = vpop.eup %884  ;;  %v623_v41 = vsel %vm574_vm2, %v883_v33, 0.0 }
 0x604   :  { %v620_v35 = vadd.f32 %v619_v32, %v618_v31  ;;  %v887_v42 = vpop.eup %886  ;;  %v625_v45 = vsel %vm574_vm2, %v885_v38, 0.0 }
 0x605   :  { %v627_v48 = vsel %vm574_vm2, %v887_v42, 0.0 }
 0x606   :  { %v622_v39 = vadd.f32 %v621_v36, %v620_v35 }
 0x608   :  { %v624_v44 = vadd.f32 %v623_v41, %v622_v39 }
 0x60a   :  { %v626_v47 = vadd.f32 %v625_v45, %v624_v44 }
 0x60c   :  { %v628_v49 = vadd.f32 %v627_v48, %v626_v47 }
 0x60e   :  { %888 = vrcp.f32 %v628_v49 }
 0x614   :  { %v889_v50 = vpop.eup %888 }
 0x615   :  { %v634_v51 = vmul.f32 %v889_v50, %v881_v30  ;;  %v632_v52 = vmul.f32 %v889_v50, %v877_v25  ;;  %v630_v54 = vmul.f32 %v889_v50, %v873_v21  ;;  %v635_v55 = vmul.f32 %v889_v50, %v883_v33 }
 0x616   :  { %v633_v57 = vmul.f32 %v889_v50, %v879_v27  ;;  %v631_v58 = vmul.f32 %v889_v50, %v875_v22  ;;  %v637_v59 = vmul.f32 %v889_v50, %v887_v42  ;;  %v636_v60 = vmul.f32 %v889_v50, %v885_v38  ;;  %v839_v27 = vld [vmem:[%s1371_s10] ss:$0 sm:$0xff]  ;;  %s765_s10 = sshll.u32 %s1373_s12, 4  ;;  %s766_s10 = int_to_ptr.hbm [resolvable:$true] %s765_s10 }
 0x617   :  { %660 = vperm.xlu2 %836, %v634_v51   ;;  %650 = vperm.xlu1 %835, %v632_v52   ;;  %768 = dma.vmem_to_hbm [thread:$0]  %s764_s3, 128, %s766_s10, [#allocation13]  }
 0x618   :  { %640 = vperm.xlu0 %834, %v630_v54  }
 0x61f   :  { %665 = vperm.xlu2 %836, %v635_v55   ;;  %655 = vperm.xlu1 %835, %v633_v57  }
 0x620   :  { %645 = vperm.xlu0 %834, %v631_v58  }
 0x627   :  { %675 = vperm.xlu1 %835, %v637_v59  }
 0x628   :  { %670 = vperm.xlu0 %834, %v636_v60  }
 0x671   :  { %v661_v4 = vpop.permute.xlu2 %660 }
 0x672   :  { %v682_v15 = vmul.f32 %v1249_v46, %v661_v4 }
 0x674   :  { %v693_v20 = vsel %vm203_vm1, %v682_v15, 0.0 }
 0x679   :  { %v666_v13 = vpop.permute.xlu2 %665 }
 0x689   :  { %v651_v2 = vpop.permute.xlu1 %650 }
 0x68a   :  { %v641_v3 = vpop.permute.xlu0 %640  ;;  %v680_v8 = vmul.f32 %v1241_v40, %v651_v2 }
 0x68b   :  { %v678_v5 = vmul.f32 %v1230_v34, %v641_v3  ;;  %v683_v34 = vmul.f32 %v1253_v53, %v666_v13 }
 0x68c   :  { %v689_v16 = vsel %vm203_vm1, %v680_v8, 0.0 }
 0x68d   :  { %v686_v10 = vsel %vm203_vm1, %v678_v5, 0.0  ;;  %v695_v22 = vsel %vm203_vm1, %v683_v34, 0.0 }
 0x691   :  { %v656_v6 = vpop.permute.xlu1 %655 }
 0x692   :  { %v646_v7 = vpop.permute.xlu0 %645  ;;  %v681_v11 = vmul.f32 %v1245_v43, %v656_v6 }
 0x693   :  { %v679_v9 = vmul.f32 %v1237_v37, %v646_v7 }
 0x694   :  { %v691_v18 = vsel %vm203_vm1, %v681_v11, 0.0 }
 0x695   :  { %v687_v12 = vsel %vm203_vm1, %v679_v9, 0.0 }
 0x696   :  { %v688_v14 = vadd.f32 %v687_v12, %v686_v10 }
 0x698   :  { %v690_v17 = vadd.f32 %v689_v16, %v688_v14 }
 0x699   :  { %v676_v19 = vpop.permute.xlu1 %675 }
 0x69a   :  { %v692_v40 = vadd.f32 %v691_v18, %v690_v17  ;;  %v671_v37 = vpop.permute.xlu0 %670  ;;  %v685_v23 = vmul.f32 %v1274_v63, %v676_v19 }
 0x69b   :  { %v684_v43 = vmul.f32 %v1269_v56, %v671_v37 }
 0x69c   :  { %v694_v21 = vadd.f32 %v693_v20, %v692_v40  ;;  %v699_v53 = vsel %vm203_vm1, %v685_v23, 0.0 }
 0x69d   :  { %v697_v24 = vsel %vm203_vm1, %v684_v43, 0.0 }
 0x69e   :  { %v696_v46 = vadd.f32 %v695_v22, %v694_v21 }
 0x6a0   :  { %v698_v25 = vadd.f32 %v697_v24, %v696_v46 }
 0x6a2   :  { %v700_v26 = vadd.f32 %v699_v53, %v698_v25 }
 0x6a4   :  { %815 = vmatmul.msk.f32.vlgmr.msrb.gmra.mxu3 %vm203_vm1, %v700_v26 }
 0x727   :  { %v729_v28 = vpop.f32.mrf.mxu3 }
 0x728   :  { %v730_v56 = vadd.f32 %v839_v27, %v729_v28 }
 0x72a   :  { %v733_v29 = vsel %vm732_vm3, %v730_v56, -inf }
 0x72b   :  { %734 = vmax.xlane.f32.xlu2 %v733_v29 }
 0x79e   :  { %v735_v63 = vpop.xlane.xlu2 %734 }
 0x79f   :  { %v736_v30 = vsub.f32 %v730_v56, %v735_v63 }
 0x7a1   :  { %v737_v31 = vmul.f32 1.442695, %v736_v30 }
 0x7a3   :  { %890 = vpow2.f32 %v737_v31 }
 0x7a9   :  { %v891_v32 = vpop.eup %890 }
 0x7aa   :  { %v739_v33 = vsel %vm732_vm3, %v891_v32, 0.0 }
 0x7ab   :  { %740 = vadd.xlane.f32.xlu0 %v739_v33 }
 0x81e   :  { %v741_v35 = vpop.xlane.xlu0 %740 }
 0x81f   :  { %892 = vlog2.f32 %v741_v35 }
 0x825   :  { %v893_v36 = vpop.eup %892 }
 0x826   :  { %v743_v38 = vmul.f32 0.6931472, %v893_v36 }
 0x828   :  { %v744_v39 = vadd.f32 %v743_v38, %v735_v63 }
 0x82a   :  { %v745_v41 = vsub.f32 %v730_v56, %v744_v39 }
 0x82c   :  { %746 = vst.msk [vmem:[#allocation11] sm:$0xff] %vm732_vm3, %v745_v41 }
 0x82d   :  { %757 = dma.vmem_to_hbm [thread:$0]  %s753_s21, 128, %s755_s23, [#allocation4]  }
 0x82e   :  { %1068 = dma.done.wait [#allocation4], 128  }
 0x82f   :  { %1069 = vsyncadd [#allocation4], 4294967168 }
 0x830   :  { %1070 = dma.done.wait [#allocation13], 128  }
 0x831   :  { %1071 = vsyncadd [#allocation13], 4294967168 }
 0x832   :  { %777 = vsyncpa [#allocation3], 1 }
 0x833   :  { %778 = vsyncpa [#allocation6], 1 }
 0x834   :  { %779 = vsyncpa [#allocation9], 1 }
 0x835   :  { %780 = vsyncpa [#allocation4], 1 }
 0x836   :  { %781 = vsyncpa [#allocation13], 1 }

</bundles_post_ra>
